<compile_context>
chip_gen: v7x
topology: tpu7x:2x2x1
jax: 0.10.0
libtpu: 0.0.40
codegen_flags: <defaults>
</compile_context>

<pallas_src>
import jax
import jax.numpy as jnp
from jax.experimental import pallas as pl
from jax.experimental.pallas import tpu as pltpu


def _leaky_relu(x, slope=0.2):
    return jnp.where(x > 0, x, slope * x)


def _round_up(x, m):
    return ((x + m - 1) // m) * m


def _num_grid_steps(batch):
    """1 grid step on single-TC chips (v5e/v6e); 2 'parallel' steps on 2-TC
    chips (v7x, v4 megacore) so Mosaic shards the batch across TensorCores."""
    try:
        kind = jax.devices()[0].device_kind.lower()
    except Exception:
        return 1
    two_core = ("v7" in kind) or ("v4" in kind)
    return 2 if (two_core and batch >= 256) else 1


def generator_kernel(
    x_ref,                        # (in_dim, TB)   concat(z, c), feature-major
    w1_ref, b1_ref,               # mapping.0:   (latent, in_dim),   (latent, 1)
    w2_ref, b2_ref,               # mapping.2:   (latent, latent),   (latent, 1)
    w3_ref, b3_ref,               # synthesis.0: (2*hidden, latent), (2*hidden, 1)
    w4_ref, b4_ref,               # synthesis.2: (hidden, 2*hidden), (hidden, 1)
    w5_ref, b5_ref,               # synthesis.4: (data_dim, hidden), (data_dim, 1)
    out_ref,                      # (data_dim, TB)
):
    f32 = jnp.float32
    x = x_ref[...]

    # ---- mapping: Linear -> ReLU -> Linear -> ReLU --------------------------
    h = jnp.dot(w1_ref[...], x, preferred_element_type=f32) + b1_ref[...]
    h = jnp.maximum(h, 0.0)
    w = jnp.dot(w2_ref[...], h, preferred_element_type=f32) + b2_ref[...]
    w = jnp.maximum(w, 0.0)

    # ---- synthesis: Linear -> LeakyReLU -> Linear -> LeakyReLU -> Linear ----
    s = _leaky_relu(jnp.dot(w3_ref[...], w, preferred_element_type=f32) + b3_ref[...])
    s = _leaky_relu(jnp.dot(w4_ref[...], s, preferred_element_type=f32) + b4_ref[...])
    out_ref[...] = (jnp.dot(w5_ref[...], s, preferred_element_type=f32)
                    + b5_ref[...]).astype(out_ref.dtype)


def generator_forward(z, c, params):
    """Full Generator MLP in one Pallas kernel (batch on the lane axis)."""
    B, z_dim = z.shape
    latent_dim = params["w2"].shape[0]
    hid2 = params["w3"].shape[1]
    hid = params["w4"].shape[1]
    data_dim = params["w5"].shape[1]

    # Static (trace-time) specialization on c: single fused layer-1 dot, no
    # dummy-zero branch and no dead DMA/MXU pass in the unconditional case.
    if c is None:
        assert params["w1"].shape[0] == z_dim, (
            "params expect no conditioning input c")
        x = z
    else:
        assert params["w1"].shape[0] == z_dim + c.shape[1], (
            "w1 rows must equal latent_dim + c_dim")
        x = jnp.concatenate([z, c], axis=1)           # one-off XLA op
    in_dim = x.shape[1]

    # Grid sizing: 1 step on single-TC chips, 2 parallel steps on 2-TC chips.
    steps = _num_grid_steps(B)
    Bp = _round_up(max(B, 128), 128 * steps)          # lane-dense batch tiles
    tb = Bp // steps
    if Bp != B:
        x = jnp.pad(x, ((0, Bp - B), (0, 0)))
    xt = x.T                                          # (in_dim, Bp) feature-major

    # Weights/biases pre-transposed to (out, in) / (out, 1); tiny one-off XLA ops.
    weight_args = []
    for idx in range(1, 6):
        weight_args.append(params[f"w{idx}"].T)
        weight_args.append(params[f"b{idx}"].T)
    # Whole array per block with constant index_map -> resident across the grid.
    weight_specs = [pl.BlockSpec(wa.shape, lambda i: (0, 0)) for wa in weight_args]

    flops = 2 * Bp * (in_dim * latent_dim + latent_dim * latent_dim
                      + latent_dim * hid2 + hid2 * hid + hid * data_dim)
    bytes_accessed = (int(xt.nbytes)
                      + sum(int(wa.nbytes) for wa in weight_args)
                      + Bp * data_dim * 4)
    cost = pl.CostEstimate(flops=flops, transcendentals=0,
                           bytes_accessed=bytes_accessed)

    out_t = pl.pallas_call(
        generator_kernel,
        out_shape=jax.ShapeDtypeStruct((data_dim, Bp), jnp.float32),
        grid=(steps,),
        in_specs=[pl.BlockSpec((in_dim, tb), lambda i: (0, i))] + weight_specs,
        out_specs=pl.BlockSpec((data_dim, tb), lambda i: (0, i)),
        compiler_params=pltpu.CompilerParams(
            dimension_semantics=("parallel",)),
        cost_estimate=cost,
    )(xt, *weight_args)

    return out_t.T[:B]                                # (B, data_dim)


def init_generator_params(key, latent_dim, c_dim, data_dim, hidden_dim):
    """Deterministic synthetic init. Weights stored as (in, out); biases as (1, out)."""
    dims = [
        (latent_dim + c_dim, latent_dim),   # mapping.0
        (latent_dim, latent_dim),           # mapping.2
        (latent_dim, hidden_dim * 2),       # synthesis.0
        (hidden_dim * 2, hidden_dim),       # synthesis.2
        (hidden_dim, data_dim),             # synthesis.4
    ]
    params = {}
    for idx, (fan_in, fan_out) in enumerate(dims, start=1):
        key, kw, kb = jax.random.split(key, 3)
        bound = 1.0 / jnp.sqrt(fan_in)
        params[f"w{idx}"] = jax.random.uniform(
            kw, (fan_in, fan_out), jnp.float32, -bound, bound)
        params[f"b{idx}"] = jax.random.uniform(
            kb, (1, fan_out), jnp.float32, -bound, bound)
    return params


def generator_reference(z, c, params):
    """Pure-JAX f32 reference of the PyTorch forward (correctness check)."""
    if c is not None:
        z = jnp.concatenate([z, c], axis=1)
    h = jnp.maximum(z @ params["w1"] + params["b1"], 0.0)
    w = jnp.maximum(h @ params["w2"] + params["b2"], 0.0)
    s = _leaky_relu(w @ params["w3"] + params["b3"])
    s = _leaky_relu(s @ params["w4"] + params["b4"])
    return s @ params["w5"] + params["b5"]


if __name__ == "__main__":
    latent_dim, c_dim, data_dim, hidden_dim = 16, 8, 32, 32
    batch = 512

    key = jax.random.PRNGKey(0)
    key, kz, kc, kp = jax.random.split(key, 4)
    z = jax.random.normal(kz, (batch, latent_dim), jnp.float32)
    c = jax.random.normal(kc, (batch, c_dim), jnp.float32)
    params = init_generator_params(kp, latent_dim, c_dim, data_dim, hidden_dim)

    out = generator_forward(z, c, params)
    out = jax.block_until_ready(out)
    ref = generator_reference(z, c, params)
    assert out.shape == (batch, data_dim), out.shape
    # MXU default-precision passes vs pure f32 reference -> relaxed tolerance.
    assert jnp.allclose(out, ref, atol=2e-2, rtol=2e-2), float(
        jnp.max(jnp.abs(out - ref)))

    # Unconditional (c=None) path: separate params with w1 of shape (latent, latent).
    key, kz2, kp2 = jax.random.split(key, 3)
    params_nc = init_generator_params(kp2, latent_dim, 0, data_dim, hidden_dim)
    z2 = jax.random.normal(kz2, (64, latent_dim), jnp.float32)
    out2 = jax.block_until_ready(generator_forward(z2, None, params_nc))
    ref2 = generator_reference(z2, None, params_nc)
    assert out2.shape == (64, data_dim), out2.shape
    assert jnp.allclose(out2, ref2, atol=2e-2, rtol=2e-2), float(
        jnp.max(jnp.abs(out2 - ref2)))

    print("KERNEL_OK")
</pallas_src>

<mosaic_0001>
module attributes {stable_mosaic.version = 11 : i64} {
  func.func @generator_kernel(%arg0: i32, %arg1: memref<24x512xf32, #tpu.memory_space<vmem>>, %arg2: memref<16x24xf32, #tpu.memory_space<vmem>>, %arg3: memref<16x1xf32, #tpu.memory_space<vmem>>, %arg4: memref<16x16xf32, #tpu.memory_space<vmem>>, %arg5: memref<16x1xf32, #tpu.memory_space<vmem>>, %arg6: memref<64x16xf32, #tpu.memory_space<vmem>>, %arg7: memref<64x1xf32, #tpu.memory_space<vmem>>, %arg8: memref<32x64xf32, #tpu.memory_space<vmem>>, %arg9: memref<32x1xf32, #tpu.memory_space<vmem>>, %arg10: memref<32x32xf32, #tpu.memory_space<vmem>>, %arg11: memref<32x1xf32, #tpu.memory_space<vmem>>, %arg12: memref<32x512xf32, #tpu.memory_space<vmem>>) attributes {dimension_semantics = [#tpu.dimension_semantics<parallel>], iteration_bounds = array<i64: 1>, scalar_prefetch = 0 : i64, scratch_operands = 0 : i64, tpu.core_type = #tpu.core_type<tc>, window_params = [{transform_indices = @transform_0, window_bounds = array<i64: 24, 512>}, {pipeline_mode = #tpu.pipeline_mode<synchronous>, transform_indices = @transform_1, window_bounds = array<i64: 16, 24>}, {pipeline_mode = #tpu.pipeline_mode<synchronous>, transform_indices = @transform_2, window_bounds = array<i64: 16, 1>}, {pipeline_mode = #tpu.pipeline_mode<synchronous>, transform_indices = @transform_3, window_bounds = array<i64: 16, 16>}, {pipeline_mode = #tpu.pipeline_mode<synchronous>, transform_indices = @transform_4, window_bounds = array<i64: 16, 1>}, {pipeline_mode = #tpu.pipeline_mode<synchronous>, transform_indices = @transform_5, window_bounds = array<i64: 64, 16>}, {pipeline_mode = #tpu.pipeline_mode<synchronous>, transform_indices = @transform_6, window_bounds = array<i64: 64, 1>}, {pipeline_mode = #tpu.pipeline_mode<synchronous>, transform_indices = @transform_7, window_bounds = array<i64: 32, 64>}, {pipeline_mode = #tpu.pipeline_mode<synchronous>, transform_indices = @transform_8, window_bounds = array<i64: 32, 1>}, {pipeline_mode = #tpu.pipeline_mode<synchronous>, transform_indices = @transform_9, window_bounds = array<i64: 32, 32>}, {pipeline_mode = #tpu.pipeline_mode<synchronous>, transform_indices = @transform_10, window_bounds = array<i64: 32, 1>}, {transform_indices = @transform_11, window_bounds = array<i64: 32, 512>}]} {
    %c0 = arith.constant 0 : index
    %c0_0 = arith.constant 0 : index
    %0 = vector.load %arg1[%c0, %c0_0] : memref<24x512xf32, #tpu.memory_space<vmem>>, vector<24x512xf32>
    %c0_1 = arith.constant 0 : index
    %c0_2 = arith.constant 0 : index
    %1 = vector.load %arg2[%c0_1, %c0_2] : memref<16x24xf32, #tpu.memory_space<vmem>>, vector<16x24xf32>
    %cst = arith.constant dense<0.000000e+00> : vector<16x512xf32>
    %2 = tpu.matmul %1, %0, %cst {dimension_numbers = #tpu.dot_dimension_numbers<[1], [0], [0], [1], [0, 0, 1, 1], [], []>} : vector<16x24xf32>, vector<24x512xf32>, vector<16x512xf32> -> vector<16x512xf32>
    %c0_3 = arith.constant 0 : index
    %c0_4 = arith.constant 0 : index
    %3 = vector.load %arg3[%c0_3, %c0_4] : memref<16x1xf32, #tpu.memory_space<vmem>>, vector<16x1xf32>
    %4 = vector.broadcast %3 : vector<16x1xf32> to vector<16x512xf32>
    %5 = arith.addf %2, %4 : vector<16x512xf32>
    %cst_5 = arith.constant 0.000000e+00 : f32
    %6 = vector.broadcast %cst_5 : f32 to vector<16x512xf32>
    %7 = arith.maximumf %5, %6 : vector<16x512xf32>
    %c0_6 = arith.constant 0 : index
    %c0_7 = arith.constant 0 : index
    %8 = vector.load %arg4[%c0_6, %c0_7] : memref<16x16xf32, #tpu.memory_space<vmem>>, vector<16x16xf32>
    %cst_8 = arith.constant dense<0.000000e+00> : vector<16x512xf32>
    %9 = tpu.matmul %8, %7, %cst_8 {dimension_numbers = #tpu.dot_dimension_numbers<[1], [0], [0], [1], [0, 0, 1, 1], [], []>} : vector<16x16xf32>, vector<16x512xf32>, vector<16x512xf32> -> vector<16x512xf32>
    %c0_9 = arith.constant 0 : index
    %c0_10 = arith.constant 0 : index
    %10 = vector.load %arg5[%c0_9, %c0_10] : memref<16x1xf32, #tpu.memory_space<vmem>>, vector<16x1xf32>
    %11 = vector.broadcast %10 : vector<16x1xf32> to vector<16x512xf32>
    %12 = arith.addf %9, %11 : vector<16x512xf32>
    %cst_11 = arith.constant 0.000000e+00 : f32
    %13 = vector.broadcast %cst_11 : f32 to vector<16x512xf32>
    %14 = arith.maximumf %12, %13 : vector<16x512xf32>
    %c0_12 = arith.constant 0 : index
    %c0_13 = arith.constant 0 : index
    %15 = vector.load %arg6[%c0_12, %c0_13] : memref<64x16xf32, #tpu.memory_space<vmem>>, vector<64x16xf32>
    %cst_14 = arith.constant dense<0.000000e+00> : vector<64x512xf32>
    %16 = tpu.matmul %15, %14, %cst_14 {dimension_numbers = #tpu.dot_dimension_numbers<[1], [0], [0], [1], [0, 0, 1, 1], [], []>} : vector<64x16xf32>, vector<16x512xf32>, vector<64x512xf32> -> vector<64x512xf32>
    %c0_15 = arith.constant 0 : index
    %c0_16 = arith.constant 0 : index
    %17 = vector.load %arg7[%c0_15, %c0_16] : memref<64x1xf32, #tpu.memory_space<vmem>>, vector<64x1xf32>
    %18 = vector.broadcast %17 : vector<64x1xf32> to vector<64x512xf32>
    %19 = arith.addf %16, %18 : vector<64x512xf32>
    %cst_17 = arith.constant 0.000000e+00 : f32
    %20 = vector.broadcast %cst_17 : f32 to vector<64x512xf32>
    %21 = arith.cmpf ogt, %19, %20 : vector<64x512xf32>
    %cst_18 = arith.constant 2.000000e-01 : f32
    %22 = vector.broadcast %cst_18 : f32 to vector<64x512xf32>
    %23 = arith.mulf %22, %19 : vector<64x512xf32>
    %24 = arith.select %21, %19, %23 : vector<64x512xi1>, vector<64x512xf32>
    %c0_19 = arith.constant 0 : index
    %c0_20 = arith.constant 0 : index
    %25 = vector.load %arg8[%c0_19, %c0_20] : memref<32x64xf32, #tpu.memory_space<vmem>>, vector<32x64xf32>
    %cst_21 = arith.constant dense<0.000000e+00> : vector<32x512xf32>
    %26 = tpu.matmul %25, %24, %cst_21 {dimension_numbers = #tpu.dot_dimension_numbers<[1], [0], [0], [1], [0, 0, 1, 1], [], []>} : vector<32x64xf32>, vector<64x512xf32>, vector<32x512xf32> -> vector<32x512xf32>
    %c0_22 = arith.constant 0 : index
    %c0_23 = arith.constant 0 : index
    %27 = vector.load %arg9[%c0_22, %c0_23] : memref<32x1xf32, #tpu.memory_space<vmem>>, vector<32x1xf32>
    %28 = vector.broadcast %27 : vector<32x1xf32> to vector<32x512xf32>
    %29 = arith.addf %26, %28 : vector<32x512xf32>
    %cst_24 = arith.constant 0.000000e+00 : f32
    %30 = vector.broadcast %cst_24 : f32 to vector<32x512xf32>
    %31 = arith.cmpf ogt, %29, %30 : vector<32x512xf32>
    %cst_25 = arith.constant 2.000000e-01 : f32
    %32 = vector.broadcast %cst_25 : f32 to vector<32x512xf32>
    %33 = arith.mulf %32, %29 : vector<32x512xf32>
    %34 = arith.select %31, %29, %33 : vector<32x512xi1>, vector<32x512xf32>
    %c0_26 = arith.constant 0 : index
    %c0_27 = arith.constant 0 : index
    %35 = vector.load %arg10[%c0_26, %c0_27] : memref<32x32xf32, #tpu.memory_space<vmem>>, vector<32x32xf32>
    %cst_28 = arith.constant dense<0.000000e+00> : vector<32x512xf32>
    %36 = tpu.matmul %35, %34, %cst_28 {dimension_numbers = #tpu.dot_dimension_numbers<[1], [0], [0], [1], [0, 0, 1, 1], [], []>} : vector<32x32xf32>, vector<32x512xf32>, vector<32x512xf32> -> vector<32x512xf32>
    %c0_29 = arith.constant 0 : index
    %c0_30 = arith.constant 0 : index
    %37 = vector.load %arg11[%c0_29, %c0_30] : memref<32x1xf32, #tpu.memory_space<vmem>>, vector<32x1xf32>
    %38 = vector.broadcast %37 : vector<32x1xf32> to vector<32x512xf32>
    %39 = arith.addf %36, %38 : vector<32x512xf32>
    %c0_31 = arith.constant 0 : index
    %c0_32 = arith.constant 0 : index
    %40 = vector.load %arg12[%c0_31, %c0_32] : memref<32x512xf32, #tpu.memory_space<vmem>>, vector<32x512xf32>
    tpu.vector_store %arg12[%c0_31, %c0_32], %39 {strides = array<i32>} : memref<32x512xf32, #tpu.memory_space<vmem>>, vector<32x512xf32>,
    return
  }
  func.func @transform_0(%arg0: i32) -> (i32, i32) {
    %c0_i32 = arith.constant 0 : i32
    %c0_i32_0 = arith.constant 0 : i32
    return %c0_i32, %arg0 : i32, i32
  }
  func.func @transform_1(%arg0: i32) -> (i32, i32) {
    %c0_i32 = arith.constant 0 : i32
    %c0_i32_0 = arith.constant 0 : i32
    %c0_i32_1 = arith.constant 0 : i32
    return %c0_i32, %c0_i32_0 : i32, i32
  }
  func.func @transform_2(%arg0: i32) -> (i32, i32) {
    %c0_i32 = arith.constant 0 : i32
    %c0_i32_0 = arith.constant 0 : i32
    %c0_i32_1 = arith.constant 0 : i32
    return %c0_i32, %c0_i32_0 : i32, i32
  }
  func.func @transform_3(%arg0: i32) -> (i32, i32) {
    %c0_i32 = arith.constant 0 : i32
    %c0_i32_0 = arith.constant 0 : i32
    %c0_i32_1 = arith.constant 0 : i32
    return %c0_i32, %c0_i32_0 : i32, i32
  }
  func.func @transform_4(%arg0: i32) -> (i32, i32) {
    %c0_i32 = arith.constant 0 : i32
    %c0_i32_0 = arith.constant 0 : i32
    %c0_i32_1 = arith.constant 0 : i32
    return %c0_i32, %c0_i32_0 : i32, i32
  }
  func.func @transform_5(%arg0: i32) -> (i32, i32) {
    %c0_i32 = arith.constant 0 : i32
    %c0_i32_0 = arith.constant 0 : i32
    %c0_i32_1 = arith.constant 0 : i32
    return %c0_i32, %c0_i32_0 : i32, i32
  }
  func.func @transform_6(%arg0: i32) -> (i32, i32) {
    %c0_i32 = arith.constant 0 : i32
    %c0_i32_0 = arith.constant 0 : i32
    %c0_i32_1 = arith.constant 0 : i32
    return %c0_i32, %c0_i32_0 : i32, i32
  }
  func.func @transform_7(%arg0: i32) -> (i32, i32) {
    %c0_i32 = arith.constant 0 : i32
    %c0_i32_0 = arith.constant 0 : i32
    %c0_i32_1 = arith.constant 0 : i32
    return %c0_i32, %c0_i32_0 : i32, i32
  }
  func.func @transform_8(%arg0: i32) -> (i32, i32) {
    %c0_i32 = arith.constant 0 : i32
    %c0_i32_0 = arith.constant 0 : i32
    %c0_i32_1 = arith.constant 0 : i32
    return %c0_i32, %c0_i32_0 : i32, i32
  }
  func.func @transform_9(%arg0: i32) -> (i32, i32) {
    %c0_i32 = arith.constant 0 : i32
    %c0_i32_0 = arith.constant 0 : i32
    %c0_i32_1 = arith.constant 0 : i32
    return %c0_i32, %c0_i32_0 : i32, i32
  }
  func.func @transform_10(%arg0: i32) -> (i32, i32) {
    %c0_i32 = arith.constant 0 : i32
    %c0_i32_0 = arith.constant 0 : i32
    %c0_i32_1 = arith.constant 0 : i32
    return %c0_i32, %c0_i32_0 : i32, i32
  }
  func.func @transform_11(%arg0: i32) -> (i32, i32) {
    %c0_i32 = arith.constant 0 : i32
    %c0_i32_0 = arith.constant 0 : i32
    return %c0_i32, %arg0 : i32, i32
  }
}

</mosaic_0001>

<bundles_post_ra>
// kernel: tpu_custom_call.1
= control target key start
LH: loop header
LB: loop body
LE: loop exit
PB: predicated region body
PF: predicated region fallthrough
CT: control target
= control target key end

     0   :  { %v1480_v7 = vmov 0.0   ;;  %v1481_v13 = vmov 0   ;;  %vm65_vm0 = vcmask 195584   ;;  %s1850_s0 = inlined_call_operand.vmem [shape: f32[24,512], index: 0, kind: input, shape index: {}]   ;;  %s1851_s1 = inlined_call_operand.vmem [shape: f32[16,24], index: 1, kind: input, shape index: {}]   ;;  %s1852_s2 = inlined_call_operand.vmem [shape: f32[16,1], index: 2, kind: input, shape index: {}]   ;;  %s1853_s3 = inlined_call_operand.vmem [shape: f32[16,16], index: 3, kind: input, shape index: {}]   ;;  %s1854_s4 = inlined_call_operand.vmem [shape: f32[16,1], index: 4, kind: input, shape index: {}]   ;;  %s1855_s5 = inlined_call_operand.vmem [shape: f32[64,16], index: 5, kind: input, shape index: {}]   ;;  %s1856_s6 = inlined_call_operand.vmem [shape: f32[64,1], index: 6, kind: input, shape index: {}]   ;;  %s1857_s7 = inlined_call_operand.vmem [shape: f32[32,64], index: 7, kind: input, shape index: {}]   ;;  %s1858_s8 = inlined_call_operand.vmem [shape: f32[32,1], index: 8, kind: input, shape index: {}]   ;;  %s1859_s9 = inlined_call_operand.vmem [shape: f32[32,32], index: 9, kind: input, shape index: {}]   ;;  %s1860_s10 = inlined_call_operand.vmem [shape: f32[32,1], index: 10, kind: input, shape index: {}]   ;;  %s1861_s11 = inlined_call_operand.hbm [shape: f32[32,512], index: 11, kind: output, shape index: {}]  }
   0x1   :  { %v40_v0 = vld [vmem:[%s1850_s0 + $0x8] sm:$0xff]  ;;  %v42_v2 = vld [vmem:[%s1850_s0 + $0x18] sm:$0xff]  ;;  %v39_v5 = vld [vmem:[%s1850_s0] sm:$0xff]  ;;  %136 = vmatprep.mubr.f32.mxu0 %v1480_v7  ;;  %213 = vmatprep.mubr.f32.mxu1 %v1480_v7 }
   0x2   :  { %v44_v1 = vld [vmem:[%s1850_s0 + $0x28] sm:$0xff]  ;;  %v46_v4 = vld [vmem:[%s1850_s0 + $0x38] sm:$0xff]  ;;  %v43_v6 = vld [vmem:[%s1850_s0 + $0x20] sm:$0xff]  ;;  %1454 = vset.pattern.permute.xlu0 %v1481_v13  ;;  %1455 = vset.pattern.permute.xlu1 %v1481_v13 }
   0x3   :  { %v1377_v3 = vpack.c.bf16 %v44_v1, %v40_v0  ;;  %v1381_v8 = vpack.c.bf16 %v46_v4, %v42_v2  ;;  %v1379_v9 = vpack.c.bf16 %v43_v6, %v39_v5  ;;  %v41_v10 = vld [vmem:[%s1850_s0 + $0x10] sm:$0xff]  ;;  %v48_v12 = vld [vmem:[%s1850_s0 + $0x48] sm:$0xff]  ;;  %v50_v15 = vld [vmem:[%s1850_s0 + $0x58] sm:$0xff] }
   0x4   :  { %v45_v11 = vld [vmem:[%s1850_s0 + $0x30] sm:$0xff]  ;;  %v53_v16 = vld [vmem:[%s1852_s2] sm:$0xff]  ;;  %v54_v20 = vld [vmem:[%s1852_s2 + $0x8] sm:$0xff] }
   0x5   :  { %1378 = vmatprep.subr.bf16.mxu0 %v1377_v3  ;;  %v1383_v14 = vpack.c.bf16 %v45_v11, %v41_v10  ;;  %1382 = vmatprep.subr.bf16.mxu1 %v1381_v8  ;;  %v47_v17 = vld [vmem:[%s1850_s0 + $0x40] sm:$0xff]  ;;  %v49_v18 = vld [vmem:[%s1850_s0 + $0x50] sm:$0xff] }
   0x6   :  { %1380 = vmatpush1.bf16.msra.mxu0 %v1379_v9  ;;  %v51_v19 = vld [vmem:[%s1851_s1] sm:$0xff]  ;;  %57 = vperm.xlu0 %1454, %v53_v16  }
   0x7   :  { %1384 = vmatpush1.bf16.msra.mxu1 %v1383_v14  ;;  %76 = vmatprep.subr.mxu0 %v48_v12 }
   0x8   :  { %153 = vmatprep.subr.mxu1 %v50_v15 }
   0xa   :  { %77 = vmatpush1.msra.mxu0 %v47_v17 }
   0xb   :  { %16 = vsyncpa [#allocation3], 0  ;;  %154 = vmatpush1.msra.mxu1 %v49_v18  ;;  %1337 = vmatmul.mubr.msk.f32.vlgmr.msra.gmra.mrb[0].mxu0 %vm65_vm0, %v51_v19  ;;  %v52_v21 = vld [vmem:[%s1851_s1 + $0x8] sm:$0xff]  ;;  %v425_v22 = vld [vmem:[%s1856_s6] sm:$0xff]  ;;  %vm248_vm1 = vcmask 130048  }
   0xc   :  { %1339 = vmatmul.mubr.msk.f32.vlgmr.msra.gmra.mrb[0].mxu1 %vm65_vm0, %v51_v19  ;;  %142 = vmatprep.mubr.f32.mxu0 %v1480_v7  ;;  %v427_v23 = vld [vmem:[%s1856_s6 + $0x10] sm:$0xff]  ;;  %v429_v24 = vld [vmem:[%s1856_s6 + $0x20] sm:$0xff]  ;;  %v237_v31 = vld [vmem:[%s1854_s4 + $0x8] sm:$0xff] }
   0xd   :  { %219 = vmatprep.mubr.f32.mxu1 %v1480_v7  ;;  %62 = vperm.xlu0 %1454, %v54_v20   ;;  %v431_v25 = vld [vmem:[%s1856_s6 + $0x30] sm:$0xff]  ;;  %v823_v26 = vld [vmem:[%s1858_s8] sm:$0xff]  ;;  %v426_v32 = vld [vmem:[%s1856_s6 + $0x8] sm:$0xff] }
   0xe   :  { %v825_v27 = vld [vmem:[%s1858_s8 + $0x10] sm:$0xff]  ;;  %v1090_v28 = vld [vmem:[%s1860_s10] sm:$0xff]  ;;  %v428_v33 = vld [vmem:[%s1856_s6 + $0x18] sm:$0xff] }
   0xf   :  { %1338 = vmatmul.mubr.msk.f32.gmra.mrb[2].mxu0 %vm65_vm0, %v52_v21  ;;  %v1092_v29 = vld [vmem:[%s1860_s10 + $0x10] sm:$0xff]  ;;  %v236_v30 = vld [vmem:[%s1854_s4] sm:$0xff]  ;;  %v430_v34 = vld [vmem:[%s1856_s6 + $0x28] sm:$0xff] }
  0x10   :  { %1340 = vmatmul.mubr.msk.f32.gmra.mrb[2].mxu1 %vm65_vm0, %v52_v21  ;;  %319 = vmatprep.mubr.f32.mxu0 %v1480_v7  ;;  %v432_v35 = vld [vmem:[%s1856_s6 + $0x38] sm:$0xff]  ;;  %v824_v36 = vld [vmem:[%s1858_s8 + $0x8] sm:$0xff]  ;;  %v234_v6 = vld [vmem:[%s1853_s3] sm:$0xff] }
  0x11   :  { %435 = vperm.xlu0 %1454, %v425_v22   ;;  %396 = vmatprep.mubr.f32.mxu1 %v1480_v7  ;;  %v826_v37 = vld [vmem:[%s1858_s8 + $0x18] sm:$0xff]  ;;  %v1091_v38 = vld [vmem:[%s1860_s10 + $0x8] sm:$0xff] }
  0x12   :  { %240 = vperm.xlu1 %1455, %v236_v30   ;;  %v1093_v39 = vld [vmem:[%s1860_s10 + $0x18] sm:$0xff]  ;;  %v235_v8 = vld [vmem:[%s1853_s3 + $0x8] sm:$0xff] }
  0x15   :  { %445 = vperm.xlu0 %1454, %v427_v23  }
  0x16   :  { %245 = vperm.xlu1 %1455, %v237_v31  }
  0x19   :  { %455 = vperm.xlu0 %1454, %v429_v24  }
  0x1a   :  { %440 = vperm.xlu1 %1455, %v426_v32  }
  0x1d   :  { %465 = vperm.xlu0 %1454, %v431_v25  }
  0x1e   :  { %450 = vperm.xlu1 %1455, %v428_v33  }
  0x21   :  { %829 = vperm.xlu0 %1454, %v823_v26  }
  0x22   :  { %460 = vperm.xlu1 %1455, %v430_v34  }
  0x25   :  { %839 = vperm.xlu0 %1454, %v825_v27  }
  0x26   :  { %470 = vperm.xlu1 %1455, %v432_v35  }
  0x29   :  { %1096 = vperm.xlu0 %1454, %v1090_v28  }
  0x2a   :  { %834 = vperm.xlu1 %1455, %v824_v36  }
  0x2d   :  { %1106 = vperm.xlu0 %1454, %v1092_v29  }
  0x2e   :  { %844 = vperm.xlu1 %1455, %v826_v37  }
  0x32   :  { %1101 = vperm.xlu1 %1455, %v1091_v38  }
  0x36   :  { %1111 = vperm.xlu1 %1455, %v1093_v39   ;;  %v417_v39 = vld [vmem:[%s1855_s5] sm:$0xff] }
  0x85   :  { %v58_v40 = vpop.permute.xlu0 %57 }
  0x8c   :  { %v63_v46 = vpop.permute.xlu0 %62 }
  0x91   :  { %v241_v9 = vpop.permute.xlu1 %240 }
  0x95   :  { %v246_v15 = vpop.permute.xlu1 %245 }
  0xde   :  { %v138_v41 = vpop.f32.mrb[0].mxu0 }
  0xdf   :  { %v215_v42 = vpop.f32.mrb[0].mxu1  ;;  %v140_v43 = vpop.f32.mrb[1].mxu0  ;;  %v139_v45 = vadd.f32 %v138_v41, %v58_v40  ;;  %v419_v41 = vld [vmem:[%s1855_s5 + $0x10] sm:$0xff] }
  0xe0   :  { %v217_v44 = vpop.f32.mrb[1].mxu1  ;;  %v216_v47 = vadd.f32 %v215_v42, %v58_v40  ;;  %v141_v48 = vadd.f32 %v140_v43, %v58_v40  ;;  %v420_v42 = vld [vmem:[%s1855_s5 + $0x18] sm:$0xff]  ;;  %v421_v43 = vld [vmem:[%s1855_s5 + $0x20] sm:$0xff] }
  0xe1   :  { %v218_v50 = vadd.f32 %v217_v44, %v58_v40  ;;  %v226_v57 = vmax.f32 %v139_v45, 0.0  ;;  %v418_v40 = vld [vmem:[%s1855_s5 + $0x8] sm:$0xff]  ;;  %v423_v45 = vld [vmem:[%s1855_s5 + $0x30] sm:$0xff] }
  0xe2   :  { %v144_v49 = vpop.f32.mrb[2].mxu0  ;;  %v228_v60 = vmax.f32 %v216_v47, 0.0  ;;  %v227_v61 = vmax.f32 %v141_v48, 0.0  ;;  %v422_v44 = vld [vmem:[%s1855_s5 + $0x28] sm:$0xff]  ;;  %v436_v47 = vpop.permute.xlu0 %435 }
  0xe3   :  { %v145_v51 = vadd.f32 %v144_v49, %v63_v46  ;;  %v221_v52 = vpop.f32.mrb[2].mxu1  ;;  %v146_v53 = vpop.f32.mrb[3].mxu0  ;;  %v229_v0 = vmax.f32 %v218_v50, 0.0 }
  0xe4   :  { %v222_v54 = vadd.f32 %v221_v52, %v63_v46  ;;  %v147_v55 = vadd.f32 %v146_v53, %v63_v46  ;;  %v223_v56 = vpop.f32.mrb[3].mxu1 }
  0xe5   :  { %v230_v58 = vmax.f32 %v145_v51, 0.0  ;;  %v224_v59 = vadd.f32 %v223_v56, %v63_v46  ;;  %v424_v46 = vld [vmem:[%s1855_s5 + $0x38] sm:$0xff] }
  0xe6   :  { %v232_v62 = vmax.f32 %v222_v54, 0.0  ;;  %v231_v63 = vmax.f32 %v147_v55, 0.0 }
  0xe7   :  { %v1387_v1 = vpack.c.bf16 %v230_v58, %v226_v57  ;;  %v233_v2 = vmax.f32 %v224_v59, 0.0  ;;  %v441_v57 = vpop.permute.xlu1 %440 }
  0xe8   :  { %v1391_v3 = vpack.c.bf16 %v232_v62, %v228_v60  ;;  %v1385_v4 = vpack.c.bf16 %v231_v63, %v227_v61 }
  0xe9   :  { %v1389_v5 = vpack.c.bf16 %v233_v2, %v229_v0 }
  0xea   :  { %1386 = vmatprep.subr.bf16.mxu0 %v1385_v4 }
  0xeb   :  { %1390 = vmatprep.subr.bf16.mxu1 %v1389_v5  ;;  %1388 = vmatpush1.bf16.msra.mxu0 %v1387_v1  ;;  %v446_v5 = vpop.permute.xlu0 %445 }
  0xec   :  { %1392 = vmatpush1.bf16.msra.mxu1 %v1391_v3 }
  0xee   :  { %1341 = vmatmul.mubr.msk.f32.vlgmr.msra.gmra.mrb[4].mxu0 %vm248_vm1, %v234_v6 }
  0xef   :  { %1343 = vmatmul.mubr.msk.f32.vlgmr.msra.gmra.mrb[4].mxu1 %vm248_vm1, %v234_v6  ;;  %325 = vmatprep.mubr.f32.mxu0 %v1480_v7 }
  0xf0   :  { %402 = vmatprep.mubr.f32.mxu1 %v1480_v7 }
  0xf2   :  { %1342 = vmatmul.mubr.msk.f32.gmra.mrb[6].mxu0 %vm248_vm1, %v235_v8 }
  0xf3   :  { %1344 = vmatmul.mubr.msk.f32.gmra.mrb[6].mxu1 %vm248_vm1, %v235_v8  ;;  %561 = vmatprep.mubr.f32.mxu0 %v1480_v7 }
  0xf4   :  { %674 = vmatprep.mubr.f32.mxu1 %v1480_v7 }
 0x1c1   :  { %v321_v10 = vpop.f32.mrb[4].mxu0 }
 0x1c2   :  { %v398_v11 = vpop.f32.mrb[4].mxu1  ;;  %v323_v12 = vpop.f32.mrb[5].mxu0  ;;  %v322_v14 = vadd.f32 %v321_v10, %v241_v9 }
 0x1c3   :  { %v400_v13 = vpop.f32.mrb[5].mxu1  ;;  %v399_v16 = vadd.f32 %v398_v11, %v241_v9  ;;  %v324_v17 = vadd.f32 %v323_v12, %v241_v9 }
 0x1c4   :  { %v401_v19 = vadd.f32 %v400_v13, %v241_v9  ;;  %v409_v26 = vmax.f32 %v322_v14, 0.0 }
 0x1c5   :  { %v327_v18 = vpop.f32.mrb[6].mxu0  ;;  %v411_v29 = vmax.f32 %v399_v16, 0.0  ;;  %v410_v30 = vmax.f32 %v324_v17, 0.0 }
 0x1c6   :  { %v328_v20 = vadd.f32 %v327_v18, %v246_v15  ;;  %v404_v21 = vpop.f32.mrb[6].mxu1  ;;  %v329_v22 = vpop.f32.mrb[7].mxu0  ;;  %v412_v33 = vmax.f32 %v401_v19, 0.0 }
 0x1c7   :  { %v405_v23 = vadd.f32 %v404_v21, %v246_v15  ;;  %v330_v24 = vadd.f32 %v329_v22, %v246_v15  ;;  %v406_v25 = vpop.f32.mrb[7].mxu1 }
 0x1c8   :  { %v413_v27 = vmax.f32 %v328_v20, 0.0  ;;  %v407_v28 = vadd.f32 %v406_v25, %v246_v15 }
 0x1c9   :  { %v415_v31 = vmax.f32 %v405_v23, 0.0  ;;  %v414_v32 = vmax.f32 %v330_v24, 0.0 }
 0x1ca   :  { %v1395_v34 = vpack.c.bf16 %v413_v27, %v409_v26  ;;  %v416_v35 = vmax.f32 %v407_v28, 0.0 }
 0x1cb   :  { %v1399_v36 = vpack.c.bf16 %v415_v31, %v411_v29  ;;  %v1393_v37 = vpack.c.bf16 %v414_v32, %v410_v30  ;;  %v456_v30 = vpop.permute.xlu0 %455  ;;  %v451_v31 = vpop.permute.xlu1 %450 }
 0x1cc   :  { %v1397_v38 = vpack.c.bf16 %v416_v35, %v412_v33 }
 0x1cd   :  { %1394 = vmatprep.subr.bf16.mxu0 %v1393_v37 }
 0x1ce   :  { %1398 = vmatprep.subr.bf16.mxu1 %v1397_v38  ;;  %1396 = vmatpush1.bf16.msra.mxu0 %v1395_v34 }
 0x1cf   :  { %1400 = vmatpush1.bf16.msra.mxu1 %v1399_v36 }
 0x1d1   :  { %1345 = vmatmul.mubr.msk.f32.vlgmr.msra.gmra.mrb[8].mxu0 %vm248_vm1, %v417_v39 }
 0x1d2   :  { %1353 = vmatmul.mubr.msk.f32.vlgmr.msra.gmra.mrb[8].mxu1 %vm248_vm1, %v417_v39  ;;  %567 = vmatprep.mubr.f32.mxu0 %v1480_v7 }
 0x1d3   :  { %680 = vmatprep.mubr.f32.mxu1 %v1480_v7 }
 0x1d5   :  { %1346 = vmatmul.mubr.msk.f32.gmra.mrb[10].mxu0 %vm248_vm1, %v418_v40 }
 0x1d6   :  { %1354 = vmatmul.mubr.msk.f32.gmra.mrb[10].mxu1 %vm248_vm1, %v418_v40  ;;  %573 = vmatprep.mubr.f32.mxu0 %v1480_v7 }
 0x1d7   :  { %686 = vmatprep.mubr.f32.mxu1 %v1480_v7 }
 0x1d9   :  { %1347 = vmatmul.mubr.msk.f32.gmra.mrb[12].mxu0 %vm248_vm1, %v419_v41 }
 0x1da   :  { %1355 = vmatmul.mubr.msk.f32.gmra.mrb[12].mxu1 %vm248_vm1, %v419_v41  ;;  %579 = vmatprep.mubr.f32.mxu0 %v1480_v7 }
 0x1db   :  { %692 = vmatprep.mubr.f32.mxu1 %v1480_v7 }
 0x1dd   :  { %1348 = vmatmul.mubr.msk.f32.gmra.mrb[14].mxu0 %vm248_vm1, %v420_v42 }
 0x1de   :  { %1356 = vmatmul.mubr.msk.f32.gmra.mrb[14].mxu1 %vm248_vm1, %v420_v42  ;;  %585 = vmatprep.mubr.f32.mxu0 %v1480_v7 }
 0x1df   :  { %698 = vmatprep.mubr.f32.mxu1 %v1480_v7 }
 0x1e1   :  { %1349 = vmatmul.mubr.msk.f32.gmra.mrb[16].mxu0 %vm248_vm1, %v421_v43 }
 0x1e2   :  { %1357 = vmatmul.mubr.msk.f32.gmra.mrb[16].mxu1 %vm248_vm1, %v421_v43  ;;  %591 = vmatprep.mubr.f32.mxu0 %v1480_v7 }
 0x1e3   :  { %704 = vmatprep.mubr.f32.mxu1 %v1480_v7 }
 0x1e5   :  { %1350 = vmatmul.mubr.msk.f32.gmra.mrb[18].mxu0 %vm248_vm1, %v422_v44 }
 0x1e6   :  { %1358 = vmatmul.mubr.msk.f32.gmra.mrb[18].mxu1 %vm248_vm1, %v422_v44  ;;  %597 = vmatprep.mubr.f32.mxu0 %v1480_v7 }
 0x1e7   :  { %710 = vmatprep.mubr.f32.mxu1 %v1480_v7 }
 0x1e9   :  { %1351 = vmatmul.mubr.msk.f32.gmra.mrb[20].mxu0 %vm248_vm1, %v423_v45 }
 0x1ea   :  { %1359 = vmatmul.mubr.msk.f32.gmra.mrb[20].mxu1 %vm248_vm1, %v423_v45  ;;  %603 = vmatprep.mubr.f32.mxu0 %v1480_v7 }
 0x1eb   :  { %716 = vmatprep.mubr.f32.mxu1 %v1480_v7 }
 0x1ed   :  { %1352 = vmatmul.mubr.msk.f32.gmra.mrb[22].mxu0 %vm248_vm1, %v424_v46 }
 0x1ee   :  { %1360 = vmatmul.mubr.msk.f32.gmra.mrb[22].mxu1 %vm248_vm1, %v424_v46  ;;  %924 = vmatprep.mubr.f32.mxu0 %v1480_v7 }
 0x1ef   :  { %1013 = vmatprep.mubr.f32.mxu1 %v1480_v7 }
 0x2a4   :  { %v563_v48 = vpop.f32.mrb[8].mxu0 }
 0x2a5   :  { %v564_v49 = vadd.f32 %v563_v48, %v436_v47  ;;  %v676_v50 = vpop.f32.mrb[8].mxu1  ;;  %v565_v51 = vpop.f32.mrb[9].mxu0 }
 0x2a6   :  { %v677_v52 = vadd.f32 %v676_v50, %v436_v47  ;;  %v566_v53 = vadd.f32 %v565_v51, %v436_v47  ;;  %v678_v54 = vpop.f32.mrb[9].mxu1 }
 0x2a7   :  { %v755_v55 = vmul.f32 0.2, %v564_v49  ;;  %v679_v56 = vadd.f32 %v678_v54, %v436_v47  ;;  %vm723_vm2 = vcmp.gt.f32.partialorder %v564_v49, 0.0 }
 0x2a8   :  { %vm725_vm3 = vcmp.gt.f32.partialorder %v677_v52, 0.0  ;;  %v757_v58 = vmul.f32 0.2, %v677_v52  ;;  %v569_v59 = vpop.f32.mrb[10].mxu0  ;;  %vm724_vm4 = vcmp.gt.f32.partialorder %v566_v53, 0.0 }
 0x2a9   :  { %v682_v60 = vpop.f32.mrb[10].mxu1  ;;  %v756_v61 = vmul.f32 0.2, %v566_v53  ;;  %v570_v62 = vadd.f32 %v569_v59, %v441_v57  ;;  %v571_v0 = vpop.f32.mrb[11].mxu0  ;;  %v1723_v2 = vsel %vm723_vm2, %v564_v49, %v755_v55  ;;  %vm726_vm5 = vcmp.gt.f32.partialorder %v679_v56, 0.0 }
 0x2aa   :  { %v683_v63 = vadd.f32 %v682_v60, %v441_v57  ;;  %v684_v1 = vpop.f32.mrb[11].mxu1  ;;  %v572_v3 = vadd.f32 %v571_v0, %v441_v57  ;;  %v789_v11 = vsel %vm725_vm3, %v677_v52, %v757_v58  ;;  %v758_v12 = vmul.f32 0.2, %v679_v56 }
 0x2ab   :  { %v685_v4 = vadd.f32 %v684_v1, %v441_v57  ;;  %vm727_vm6 = vcmp.gt.f32.partialorder %v570_v62, 0.0  ;;  %v759_v6 = vmul.f32 0.2, %v570_v62  ;;  %v788_v33 = vsel %vm724_vm4, %v566_v53, %v756_v61  ;;  %v461_v57 = vpop.permute.xlu1 %460 }
 0x2ac   :  { %vm729_vm7 = vcmp.gt.f32.partialorder %v683_v63, 0.0  ;;  %v761_v8 = vmul.f32 0.2, %v683_v63  ;;  %vm728_vm8 = vcmp.gt.f32.partialorder %v572_v3, 0.0  ;;  %v760_v9 = vmul.f32 0.2, %v572_v3 }
 0x2ad   :  { %vm730_vm9 = vcmp.gt.f32.partialorder %v685_v4, 0.0  ;;  %v762_v10 = vmul.f32 0.2, %v685_v4  ;;  %v791_v13 = vsel %vm727_vm6, %v570_v62, %v759_v6  ;;  %v575_v15 = vpop.f32.mrb[12].mxu0  ;;  %v688_v16 = vpop.f32.mrb[12].mxu1  ;;  %v790_v34 = vsel %vm726_vm5, %v679_v56, %v758_v12 }
 0x2ae   :  { %v793_v14 = vsel %vm729_vm7, %v683_v63, %v761_v8  ;;  %v1403_v17 = vpack.c.bf16 %v791_v13, %v1723_v2  ;;  %v576_v19 = vadd.f32 %v575_v15, %v446_v5  ;;  %v689_v20 = vadd.f32 %v688_v16, %v446_v5  ;;  %v577_v21 = vpop.f32.mrb[13].mxu0  ;;  %v690_v22 = vpop.f32.mrb[13].mxu1 }
 0x2af   :  { %v1419_v18 = vpack.c.bf16 %v793_v14, %v789_v11  ;;  %v578_v23 = vadd.f32 %v577_v21, %v446_v5  ;;  %v1727_v24 = vadd.f32 %v690_v22, %v446_v5  ;;  %v792_v26 = vsel %vm728_vm8, %v572_v3, %v760_v9 }
 0x2b0   :  { %v581_v25 = vpop.f32.mrb[14].mxu0  ;;  %v794_v27 = vsel %vm730_vm9, %v685_v4, %v762_v10  ;;  %vm731_vm10 = vcmp.gt.f32.partialorder %v576_v19, 0.0  ;;  %v763_v28 = vmul.f32 0.2, %v576_v19  ;;  %vm733_vm11 = vcmp.gt.f32.partialorder %v689_v20, 0.0 }
 0x2b1   :  { %v765_v29 = vmul.f32 0.2, %v689_v20  ;;  %vm732_vm12 = vcmp.gt.f32.partialorder %v578_v23, 0.0  ;;  %v764_v32 = vmul.f32 0.2, %v578_v23  ;;  %vm734_vm13 = vcmp.gt.f32.partialorder %v1727_v24, 0.0 }
 0x2b2   :  { %v1733_v35 = vsel %vm731_vm10, %v576_v19, %v763_v28  ;;  %v1737_v36 = vmul.f32 0.2, %v1727_v24  ;;  %v582_v37 = vadd.f32 %v581_v25, %v451_v31  ;;  %v694_v38 = vpop.f32.mrb[14].mxu1  ;;  %v583_v39 = vpop.f32.mrb[15].mxu0  ;;  %v1401_v40 = vpack.c.bf16 %v792_v26, %v788_v33 }
 0x2b3   :  { %v1739_v41 = vsel %vm733_vm11, %v689_v20, %v765_v29  ;;  %v695_v42 = vadd.f32 %v694_v38, %v451_v31  ;;  %v584_v43 = vadd.f32 %v583_v39, %v451_v31  ;;  %v696_v44 = vpop.f32.mrb[15].mxu1  ;;  %v1417_v45 = vpack.c.bf16 %v794_v27, %v790_v34  ;;  %v466_v28 = vpop.permute.xlu0 %465 }
 0x2b4   :  { %v587_v46 = vpop.f32.mrb[16].mxu0  ;;  %vm735_vm14 = vcmp.gt.f32.partialorder %v582_v37, 0.0  ;;  %v767_v47 = vmul.f32 0.2, %v582_v37  ;;  %v697_v48 = vadd.f32 %v696_v44, %v451_v31  ;;  %1402 = vmatprep.subr.bf16.mxu0 %v1401_v40  ;;  %v796_v53 = vsel %vm732_vm12, %v578_v23, %v764_v32  ;;  %v471_v32 = vpop.permute.xlu1 %470 }
 0x2b5   :  { %v588_v49 = vadd.f32 %v587_v46, %v456_v30  ;;  %v700_v50 = vpop.f32.mrb[16].mxu1  ;;  %v589_v51 = vpop.f32.mrb[17].mxu0  ;;  %vm737_vm15 = vcmp.gt.f32.partialorder %v695_v42, 0.0  ;;  %v769_v52 = vmul.f32 0.2, %v695_v42  ;;  %vm736_vm0 = vcmp.gt.f32.partialorder %v584_v43, 0.0  ;;  %1418 = vmatprep.subr.bf16.mxu1 %v1417_v45  ;;  %1404 = vmatpush1.bf16.msra.mxu0 %v1403_v17 }
 0x2b6   :  { %v799_v54 = vsel %vm735_vm14, %v582_v37, %v767_v47  ;;  %v768_v55 = vmul.f32 0.2, %v584_v43  ;;  %vm738_vm1 = vcmp.gt.f32.partialorder %v697_v48, 0.0  ;;  %1420 = vmatpush1.bf16.msra.mxu1 %v1419_v18  ;;  %v702_v56 = vpop.f32.mrb[17].mxu1  ;;  %v701_v61 = vadd.f32 %v700_v50, %v456_v30 }
 0x2b7   :  { %vm739_vm2 = vcmp.gt.f32.partialorder %v588_v49, 0.0  ;;  %v1407_v58 = vpack.c.bf16 %v799_v54, %v1733_v35  ;;  %v801_v59 = vsel %vm737_vm15, %v695_v42, %v769_v52  ;;  %v771_v60 = vmul.f32 0.2, %v588_v49 }
 0x2b8   :  { %v593_v62 = vpop.f32.mrb[18].mxu0  ;;  %v1423_v63 = vpack.c.bf16 %v801_v59, %v1739_v41  ;;  %v590_v0 = vadd.f32 %v589_v51, %v456_v30  ;;  %v1744_v1 = vadd.f32 %v702_v56, %v456_v30  ;;  %v770_v5 = vmul.f32 0.2, %v697_v48 }
 0x2b9   :  { %v594_v2 = vadd.f32 %v593_v62, %v461_v57  ;;  %v706_v3 = vpop.f32.mrb[18].mxu1  ;;  %v595_v4 = vpop.f32.mrb[19].mxu0  ;;  %vm741_vm3 = vcmp.gt.f32.partialorder %v701_v61, 0.0  ;;  %v773_v6 = vmul.f32 0.2, %v701_v61  ;;  %v1747_v10 = vsel %vm739_vm2, %v588_v49, %v771_v60 }
 0x2ba   :  { %v707_v8 = vadd.f32 %v706_v3, %v461_v57  ;;  %v708_v9 = vpop.f32.mrb[19].mxu1  ;;  %vm740_vm4 = vcmp.gt.f32.partialorder %v590_v0, 0.0  ;;  %v772_v11 = vmul.f32 0.2, %v590_v0  ;;  %v1750_v12 = vmul.f32 0.2, %v1744_v1 }
 0x2bb   :  { %v1752_v13 = vsel %vm741_vm3, %v701_v61, %v773_v6  ;;  %vm742_vm5 = vcmp.gt.f32.partialorder %v1744_v1, 0.0  ;;  %vm743_vm6 = vcmp.gt.f32.partialorder %v594_v2, 0.0  ;;  %v775_v14 = vmul.f32 0.2, %v594_v2 }
 0x2bc   :  { %vm745_vm7 = vcmp.gt.f32.partialorder %v707_v8, 0.0  ;;  %v599_v15 = vpop.f32.mrb[20].mxu0  ;;  %v777_v16 = vmul.f32 0.2, %v707_v8  ;;  %v596_v17 = vadd.f32 %v595_v4, %v461_v57  ;;  %v709_v18 = vadd.f32 %v708_v9, %v461_v57 }
 0x2bd   :  { %v800_v19 = vsel %vm736_vm0, %v584_v43, %v768_v55  ;;  %v712_v20 = vpop.f32.mrb[20].mxu1  ;;  %v601_v21 = vpop.f32.mrb[21].mxu0  ;;  %v1756_v22 = vsel %vm743_vm6, %v594_v2, %v775_v14  ;;  %v798_v25 = vsel %vm734_vm13, %v1727_v24, %v1737_v36  ;;  %v802_v26 = vsel %vm738_vm1, %v697_v48, %v770_v5 }
 0x2be   :  { %v1405_v23 = vpack.c.bf16 %v800_v19, %v796_v53  ;;  %v714_v27 = vpop.f32.mrb[21].mxu1  ;;  %v1411_v29 = vpack.c.bf16 %v1756_v22, %v1747_v10  ;;  %v809_v30 = vsel %vm745_vm7, %v707_v8, %v777_v16  ;;  %vm744_vm8 = vcmp.gt.f32.partialorder %v596_v17, 0.0  ;;  %v819_v10 = vld [vmem:[%s1857_s7] sm:$0xff]  ;;  %v830_v14 = vpop.permute.xlu0 %829 }
 0x2bf   :  { %v776_v31 = vmul.f32 0.2, %v596_v17  ;;  %v1427_v33 = vpack.c.bf16 %v809_v30, %v1752_v13  ;;  %vm746_vm9 = vcmp.gt.f32.partialorder %v709_v18, 0.0  ;;  %v778_v34 = vmul.f32 0.2, %v709_v18  ;;  %v822_v13 = vld [vmem:[%s1857_s7 + $0x18] sm:$0xff] }
 0x2c0   :  { %1406 = vmatprep.subr.bf16.mxu0 %v1405_v23  ;;  %v1421_v35 = vpack.c.bf16 %v802_v26, %v798_v25  ;;  %v605_v37 = vpop.f32.mrb[22].mxu0  ;;  %v600_v24 = vadd.f32 %v599_v15, %v466_v28  ;;  %v713_v36 = vadd.f32 %v712_v20, %v466_v28  ;;  %v602_v38 = vadd.f32 %v601_v21, %v466_v28  ;;  %v835_v25 = vpop.permute.xlu1 %834 }
 0x2c1   :  { %1408 = vmatpush1.bf16.msra.mxu0 %v1407_v58  ;;  %v715_v39 = vadd.f32 %v714_v27, %v466_v28  ;;  %v718_v40 = vpop.f32.mrb[22].mxu1  ;;  %v607_v41 = vpop.f32.mrb[23].mxu0  ;;  %v606_v42 = vadd.f32 %v605_v37, %v471_v32  ;;  %v804_v46 = vsel %vm740_vm4, %v590_v0, %v772_v11  ;;  %v808_v58 = vsel %vm744_vm8, %v596_v17, %v776_v31  ;;  %v820_v11 = vld [vmem:[%s1857_s7 + $0x8] sm:$0xff] }
 0x2c2   :  { %1422 = vmatprep.subr.bf16.mxu1 %v1421_v35  ;;  %v719_v43 = vadd.f32 %v718_v40, %v471_v32  ;;  %v608_v44 = vadd.f32 %v607_v41, %v471_v32  ;;  %v720_v45 = vpop.f32.mrb[23].mxu1  ;;  %vm747_vm10 = vcmp.gt.f32.partialorder %v600_v24, 0.0  ;;  %v779_v47 = vmul.f32 0.2, %v600_v24 }
 0x2c3   :  { %1424 = vmatpush1.bf16.msra.mxu1 %v1423_v63  ;;  %vm749_vm11 = vcmp.gt.f32.partialorder %v713_v36, 0.0  ;;  %v781_v48 = vmul.f32 0.2, %v713_v36  ;;  %vm748_vm12 = vcmp.gt.f32.partialorder %v602_v38, 0.0  ;;  %v780_v49 = vmul.f32 0.2, %v602_v38 }
 0x2c4   :  { %vm750_vm13 = vcmp.gt.f32.partialorder %v715_v39, 0.0  ;;  %v782_v50 = vmul.f32 0.2, %v715_v39  ;;  %v811_v51 = vsel %vm747_vm10, %v600_v24, %v779_v47  ;;  %vm751_vm14 = vcmp.gt.f32.partialorder %v606_v42, 0.0 }
 0x2c5   :  { %v813_v52 = vsel %vm749_vm11, %v713_v36, %v781_v48  ;;  %v783_v53 = vmul.f32 0.2, %v606_v42  ;;  %vm753_vm15 = vcmp.gt.f32.partialorder %v719_v43, 0.0  ;;  %v785_v54 = vmul.f32 0.2, %v719_v43 }
 0x2c6   :  { %vm752_vm0 = vcmp.gt.f32.partialorder %v608_v44, 0.0  ;;  %v784_v55 = vmul.f32 0.2, %v608_v44  ;;  %v721_v57 = vadd.f32 %v720_v45, %v471_v32  ;;  %v806_v59 = vsel %vm742_vm5, %v1744_v1, %v1750_v12  ;;  %v821_v12 = vld [vmem:[%s1857_s7 + $0x10] sm:$0xff] }
 0x2c7   :  { %v815_v56 = vsel %vm751_vm14, %v606_v42, %v783_v53  ;;  %v817_v61 = vsel %vm753_vm15, %v719_v43, %v785_v54  ;;  %v1409_v62 = vpack.c.bf16 %v808_v58, %v804_v46  ;;  %v810_v63 = vsel %vm746_vm9, %v709_v18, %v778_v34 }
 0x2c8   :  { %v1415_v60 = vpack.c.bf16 %v815_v56, %v811_v51  ;;  %v1431_v0 = vpack.c.bf16 %v817_v61, %v813_v52  ;;  %vm754_vm1 = vcmp.gt.f32.partialorder %v721_v57, 0.0  ;;  %v786_v2 = vmul.f32 0.2, %v721_v57  ;;  %v845_v61 = vpop.permute.xlu1 %844 }
 0x2c9   :  { %v1425_v3 = vpack.c.bf16 %v810_v63, %v806_v59  ;;  %1410 = vmatprep.subr.bf16.mxu0 %v1409_v62  ;;  %v812_v4 = vsel %vm748_vm12, %v602_v38, %v780_v49  ;;  %v816_v5 = vsel %vm752_vm0, %v608_v44, %v784_v55  ;;  %v814_v8 = vsel %vm750_vm13, %v715_v39, %v782_v50  ;;  %v840_v39 = vpop.permute.xlu0 %839 }
 0x2ca   :  { %1412 = vmatpush1.bf16.msra.mxu0 %v1411_v29  ;;  %v1413_v6 = vpack.c.bf16 %v816_v5, %v812_v4  ;;  %v818_v1 = vsel %vm754_vm1, %v721_v57, %v786_v2  ;;  %vm847_vm2 = vcmask 523264  }
 0x2cb   :  { %1426 = vmatprep.subr.bf16.mxu1 %v1425_v3  ;;  %v1429_v9 = vpack.c.bf16 %v818_v1, %v814_v8 }
 0x2cc   :  { %1428 = vmatpush1.bf16.msra.mxu1 %v1427_v33  ;;  %1414 = vmatprep.subr.bf16.mxu0 %v1413_v6 }
 0x2cd   :  { %1430 = vmatprep.subr.bf16.mxu1 %v1429_v9 }
 0x2ce   :  { %1416 = vmatpush1.bf16.msra.mxu0 %v1415_v60 }
 0x2d0   :  { %1432 = vmatpush1.bf16.msra.mxu1 %v1431_v0 }
 0x2d1   :  { %1361 = vmatmul.mubr.msk.f32.vlgmr.msra.gmra.mrb[24].mxu0 %vm847_vm2, %v819_v10 }
 0x2d2   :  { %930 = vmatprep.mubr.f32.mxu0 %v1480_v7 }
 0x2d3   :  { %1365 = vmatmul.mubr.msk.f32.vlgmr.msra.gmra.mrb[24].mxu1 %vm847_vm2, %v819_v10 }
 0x2d4   :  { %1019 = vmatprep.mubr.f32.mxu1 %v1480_v7 }
 0x2d5   :  { %1362 = vmatmul.mubr.msk.f32.gmra.mrb[26].mxu0 %vm847_vm2, %v820_v11 }
 0x2d6   :  { %936 = vmatprep.mubr.f32.mxu0 %v1480_v7 }
 0x2d7   :  { %1366 = vmatmul.mubr.msk.f32.gmra.mrb[26].mxu1 %vm847_vm2, %v820_v11 }
 0x2d8   :  { %1025 = vmatprep.mubr.f32.mxu1 %v1480_v7 }
 0x2d9   :  { %1363 = vmatmul.mubr.msk.f32.gmra.mrb[28].mxu0 %vm847_vm2, %v821_v12 }
 0x2da   :  { %942 = vmatprep.mubr.f32.mxu0 %v1480_v7 }
 0x2db   :  { %1367 = vmatmul.mubr.msk.f32.gmra.mrb[28].mxu1 %vm847_vm2, %v821_v12 }
 0x2dc   :  { %1031 = vmatprep.mubr.f32.mxu1 %v1480_v7 }
 0x2dd   :  { %1364 = vmatmul.mubr.msk.f32.gmra.mrb[30].mxu0 %vm847_vm2, %v822_v13 }
 0x2de   :  { %1191 = vmatprep.mubr.f32.mxu0 %v1480_v7 }
 0x2df   :  { %1368 = vmatmul.mubr.msk.f32.gmra.mrb[30].mxu1 %vm847_vm2, %v822_v13 }
 0x2e0   :  { %1280 = vmatprep.mubr.f32.mxu1 %v1480_v7 }
 0x3a4   :  { %v926_v15 = vpop.f32.mrb[24].mxu0 }
 0x3a5   :  { %v927_v16 = vadd.f32 %v926_v15, %v830_v14  ;;  %v928_v18 = vpop.f32.mrb[25].mxu0 }
 0x3a6   :  { %v1015_v17 = vpop.f32.mrb[24].mxu1  ;;  %v929_v20 = vadd.f32 %v928_v18, %v830_v14 }
 0x3a7   :  { %v1016_v19 = vadd.f32 %v1015_v17, %v830_v14  ;;  %v1017_v21 = vpop.f32.mrb[25].mxu1  ;;  %v1054_v22 = vmul.f32 0.2, %v927_v16  ;;  %vm1038_vm3 = vcmp.gt.f32.partialorder %v927_v16, 0.0 }
 0x3a8   :  { %v1018_v23 = vadd.f32 %v1017_v21, %v830_v14  ;;  %v932_v27 = vpop.f32.mrb[26].mxu0  ;;  %vm1039_vm5 = vcmp.gt.f32.partialorder %v929_v20, 0.0  ;;  %v1055_v29 = vmul.f32 0.2, %v929_v20 }
 0x3a9   :  { %vm1040_vm4 = vcmp.gt.f32.partialorder %v1016_v19, 0.0  ;;  %v1056_v26 = vmul.f32 0.2, %v1016_v19  ;;  %v933_v30 = vadd.f32 %v932_v27, %v835_v25  ;;  %v934_v32 = vpop.f32.mrb[27].mxu0  ;;  %v1070_v34 = vsel %vm1038_vm3, %v927_v16, %v1054_v22 }
 0x3aa   :  { %v1021_v28 = vpop.f32.mrb[26].mxu1  ;;  %v1057_v35 = vmul.f32 0.2, %v1018_v23  ;;  %v935_v37 = vadd.f32 %v934_v32, %v835_v25  ;;  %vm1041_vm8 = vcmp.gt.f32.partialorder %v1018_v23, 0.0  ;;  %v1071_v58 = vsel %vm1039_vm5, %v929_v20, %v1055_v29  ;;  %v1087_v29 = vld [vmem:[%s1859_s9 + $0x8] sm:$0xff]  ;;  %v1097_v32 = vpop.permute.xlu0 %1096 }
 0x3ab   :  { %v1022_v31 = vadd.f32 %v1021_v28, %v835_v25  ;;  %v1023_v33 = vpop.f32.mrb[27].mxu1  ;;  %vm1042_vm6 = vcmp.gt.f32.partialorder %v933_v30, 0.0  ;;  %v1058_v36 = vmul.f32 0.2, %v933_v30  ;;  %v1072_v42 = vsel %vm1040_vm4, %v1016_v19, %v1056_v26  ;;  %v1086_v28 = vld [vmem:[%s1859_s9] sm:$0xff] }
 0x3ac   :  { %v1024_v24 = vadd.f32 %v1023_v33, %v835_v25  ;;  %vm1043_vm9 = vcmp.gt.f32.partialorder %v935_v37, 0.0  ;;  %v1059_v40 = vmul.f32 0.2, %v935_v37  ;;  %v938_v45 = vpop.f32.mrb[28].mxu0  ;;  %v1073_v59 = vsel %vm1041_vm8, %v1018_v23, %v1057_v35 }
 0x3ad   :  { %vm1044_vm7 = vcmp.gt.f32.partialorder %v1022_v31, 0.0  ;;  %v1060_v38 = vmul.f32 0.2, %v1022_v31  ;;  %v1074_v43 = vsel %vm1042_vm6, %v933_v30, %v1058_v36  ;;  %v939_v49 = vadd.f32 %v938_v45, %v840_v39  ;;  %v940_v51 = vpop.f32.mrb[29].mxu0  ;;  %v1088_v30 = vld [vmem:[%s1859_s9 + $0x10] sm:$0xff] }
 0x3ae   :  { %v1061_v41 = vmul.f32 0.2, %v1024_v24  ;;  %vm1045_vm10 = vcmp.gt.f32.partialorder %v1024_v24, 0.0  ;;  %v1027_v46 = vpop.f32.mrb[28].mxu1  ;;  %v1435_v47 = vpack.c.bf16 %v1074_v43, %v1070_v34  ;;  %v941_v53 = vadd.f32 %v940_v51, %v840_v39 }
 0x3af   :  { %v1076_v44 = vsel %vm1044_vm7, %v1022_v31, %v1060_v38  ;;  %v1028_v50 = vadd.f32 %v1027_v46, %v840_v39  ;;  %v1029_v52 = vpop.f32.mrb[29].mxu1  ;;  %v1075_v56 = vsel %vm1043_vm9, %v935_v37, %v1059_v40  ;;  %v1062_v57 = vmul.f32 0.2, %v939_v49  ;;  %v1089_v31 = vld [vmem:[%s1859_s9 + $0x18] sm:$0xff]  ;;  %v1102_v40 = vpop.permute.xlu1 %1101  ;;  %s1482_s9 = smov [#allocation2]  }
 0x3b0   :  { %v1443_v48 = vpack.c.bf16 %v1076_v44, %v1072_v42  ;;  %v1030_v54 = vadd.f32 %v1029_v52, %v840_v39  ;;  %v944_v55 = vpop.f32.mrb[30].mxu0  ;;  %v1077_v60 = vsel %vm1045_vm10, %v1024_v24, %v1061_v41  ;;  %vm1046_vm11 = vcmp.gt.f32.partialorder %v939_v49, 0.0  ;;  %s1326_s24 = sshll.u32 %s1482_s9, 4  ;;  %s1327_s24 = int_to_ptr.vmem [resolvable:$true] %s1326_s24 }
 0x3b1   :  { %vm1048_vm12 = vcmp.gt.f32.partialorder %v1028_v50, 0.0  ;;  %v1064_v62 = vmul.f32 0.2, %v1028_v50  ;;  %vm1047_vm13 = vcmp.gt.f32.partialorder %v941_v53, 0.0  ;;  %v1063_v63 = vmul.f32 0.2, %v941_v53  ;;  %p1461_p1 = scmp.lt.s32.totalorder %s1327_s24, %s1327_s24 }
 0x3b2   :  { %vm1049_vm14 = vcmp.gt.f32.partialorder %v1030_v54, 0.0  ;;  %v945_v0 = vadd.f32 %v944_v55, %v845_v61  ;;  %v1033_v2 = vpop.f32.mrb[30].mxu1  ;;  %v946_v3 = vpop.f32.mrb[31].mxu0  ;;  %v1433_v4 = vpack.c.bf16 %v1075_v56, %v1071_v58  ;;  %v1065_v5 = vmul.f32 0.2, %v1030_v54  ;;  %s1456_s25 = scalar_lea.vmem %s1327_s24, 2048 }
 0x3b3   :  { %v1034_v6 = vadd.f32 %v1033_v2, %v845_v61  ;;  %v947_v8 = vadd.f32 %v946_v3, %v845_v61  ;;  %v1035_v1 = vpop.f32.mrb[31].mxu1  ;;  %v1441_v9 = vpack.c.bf16 %v1077_v60, %v1073_v59  ;;  %v1078_v10 = vsel %vm1046_vm11, %v939_v49, %v1062_v57  ;;  %v1112_v57 = vpop.permute.xlu1 %1111  ;;  %p1457_p0 = scmp.ne.s32.totalorder %s1327_s24, %s1456_s25  ;;  %p1462_p2 = scmp.lt.s32.totalorder %s1456_s25, %s1456_s25 }
 0x3b4   :  { %vm1050_vm15 = vcmp.gt.f32.partialorder %v945_v0, 0.0  ;;  %v1066_v11 = vmul.f32 0.2, %v945_v0  ;;  %v1036_v12 = vadd.f32 %v1035_v1, %v845_v61  ;;  %1434 = vmatprep.subr.bf16.mxu0 %v1433_v4  ;;  %v1080_v15 = vsel %vm1048_vm12, %v1028_v50, %v1064_v62 }
 0x3b5   :  { %vm1052_vm0 = vcmp.gt.f32.partialorder %v1034_v6, 0.0  ;;  %v1068_v13 = vmul.f32 0.2, %v1034_v6  ;;  %vm1051_vm1 = vcmp.gt.f32.partialorder %v947_v8, 0.0  ;;  %v1067_v14 = vmul.f32 0.2, %v947_v8  ;;  %1442 = vmatprep.subr.bf16.mxu1 %v1441_v9  ;;  %1436 = vmatpush1.bf16.msra.mxu0 %v1435_v47  ;;  %p1463_p3 = por %p1462_p2, %p1461_p1 }
 0x3b6   :  { %v1082_v16 = vsel %vm1050_vm15, %v945_v0, %v1066_v11  ;;  %vm1053_vm2 = vcmp.gt.f32.partialorder %v1036_v12, 0.0  ;;  %v1069_v17 = vmul.f32 0.2, %v1036_v12  ;;  %1444 = vmatpush1.bf16.msra.mxu1 %v1443_v48  ;;  %v1079_v20 = vsel %vm1047_vm13, %v941_v53, %v1063_v63  ;;  %v1107_v48 = vpop.permute.xlu0 %1106 }
 0x3b7   :  { %v1439_v18 = vpack.c.bf16 %v1082_v16, %v1078_v10  ;;  %v1084_v19 = vsel %vm1052_vm0, %v1034_v6, %v1068_v13  ;;  %v1083_v21 = vsel %vm1051_vm1, %v947_v8, %v1067_v14  ;;  %v1081_v25 = vsel %vm1049_vm14, %v1030_v54, %v1065_v5  ;;  %p1464_p4 = pnand %p1463_p3, %p1457_p0 }
 0x3b8   :  { %v1447_v22 = vpack.c.bf16 %v1084_v19, %v1080_v15  ;;  %v1437_v23 = vpack.c.bf16 %v1083_v21, %v1079_v20  ;;  %v1085_v26 = vsel %vm1053_vm2, %v1036_v12, %v1069_v17  ;;  %vm1114_vm3 = vcmask 261120  }
 0x3b9   :  { %v1445_v27 = vpack.c.bf16 %v1085_v26, %v1081_v25 }
 0x3ba   :  { %1438 = vmatprep.subr.bf16.mxu0 %v1437_v23 }
 0x3bb   :  { %1446 = vmatprep.subr.bf16.mxu1 %v1445_v27  ;;  %1440 = vmatpush1.bf16.msra.mxu0 %v1439_v18 }
 0x3bc   :  { %1448 = vmatpush1.bf16.msra.mxu1 %v1447_v22 }
 0x3be   :  { %1369 = vmatmul.mubr.msk.f32.vlgmr.msra.gmra.mrb[32].mxu0 %vm1114_vm3, %v1086_v28 }
 0x3bf   :  { %1373 = vmatmul.mubr.msk.f32.vlgmr.msra.gmra.mrb[32].mxu1 %vm1114_vm3, %v1086_v28  ;;  %1197 = vmatprep.mubr.f32.mxu0 %v1480_v7 }
 0x3c0   :  { %1286 = vmatprep.mubr.f32.mxu1 %v1480_v7 }
 0x3c2   :  { %1370 = vmatmul.mubr.msk.f32.gmra.mrb[34].mxu0 %vm1114_vm3, %v1087_v29 }
 0x3c3   :  { %1374 = vmatmul.mubr.msk.f32.gmra.mrb[34].mxu1 %vm1114_vm3, %v1087_v29  ;;  %1203 = vmatprep.mubr.f32.mxu0 %v1480_v7 }
 0x3c4   :  { %1292 = vmatprep.mubr.f32.mxu1 %v1480_v7 }
 0x3c6   :  { %1371 = vmatmul.mubr.msk.f32.gmra.mrb[36].mxu0 %vm1114_vm3, %v1088_v30 }
 0x3c7   :  { %1375 = vmatmul.mubr.msk.f32.gmra.mrb[36].mxu1 %vm1114_vm3, %v1088_v30  ;;  %1209 = vmatprep.mubr.f32.mxu0 %v1480_v7 }
 0x3c8   :  { %1298 = vmatprep.mubr.f32.mxu1 %v1480_v7 }
 0x3ca   :  { %1372 = vmatmul.mubr.msk.f32.gmra.mrb[38].mxu0 %vm1114_vm3, %v1089_v31 }
 0x3cb   :  { %1376 = vmatmul.mubr.msk.f32.gmra.mrb[38].mxu1 %vm1114_vm3, %v1089_v31 }
 0x491   :  { %v1193_v33 = vpop.f32.mrb[32].mxu0 }
 0x492   :  { %v1194_v34 = vadd.f32 %v1193_v33, %v1097_v32  ;;  %v1282_v35 = vpop.f32.mrb[32].mxu1  ;;  %v1195_v37 = vpop.f32.mrb[33].mxu0 }
 0x493   :  { %v1283_v24 = vadd.f32 %v1282_v35, %v1097_v32  ;;  %v1196_v36 = vadd.f32 %v1195_v37, %v1097_v32  ;;  %v1284_v38 = vpop.f32.mrb[33].mxu1 }
 0x494   :  { %1305 = vst [vmem:[#allocation2] sm:$0xff] %v1194_v34  ;;  %v1285_v39 = vadd.f32 %v1284_v38, %v1097_v32 }
 0x495   :  { %1307 = vst [vmem:[#allocation2 + $0x10] sm:$0xff] %v1283_v24  ;;  %1306 = vst [vmem:[#allocation2 + $0x8] sm:$0xff] %v1196_v36  ;;  %v1199_v41 = vpop.f32.mrb[34].mxu0 }
 0x496   :  { %1308 = vst [vmem:[#allocation2 + $0x18] sm:$0xff] %v1285_v39  ;;  %v1200_v7 = vadd.f32 %v1199_v41, %v1102_v40  ;;  %v1288_v42 = vpop.f32.mrb[34].mxu1  ;;  %v1201_v43 = vpop.f32.mrb[35].mxu0 }
 0x497   :  { %v1289_v44 = vadd.f32 %v1288_v42, %v1102_v40  ;;  %v1202_v45 = vadd.f32 %v1201_v43, %v1102_v40  ;;  %v1290_v46 = vpop.f32.mrb[35].mxu1 }
 0x498   :  { %1309 = vst [vmem:[#allocation2 + $0x20] sm:$0xff] %v1200_v7  ;;  %v1291_v47 = vadd.f32 %v1290_v46, %v1102_v40 }
 0x499   :  { %1311 = vst [vmem:[#allocation2 + $0x30] sm:$0xff] %v1289_v44  ;;  %1310 = vst [vmem:[#allocation2 + $0x28] sm:$0xff] %v1202_v45  ;;  %v1205_v49 = vpop.f32.mrb[36].mxu0 }
 0x49a   :  { %1312 = vst [vmem:[#allocation2 + $0x38] sm:$0xff] %v1291_v47  ;;  %v1206_v50 = vadd.f32 %v1205_v49, %v1107_v48  ;;  %v1294_v51 = vpop.f32.mrb[36].mxu1  ;;  %v1207_v52 = vpop.f32.mrb[37].mxu0 }
 0x49b   :  { %v1295_v53 = vadd.f32 %v1294_v51, %v1107_v48  ;;  %v1208_v54 = vadd.f32 %v1207_v52, %v1107_v48  ;;  %v1296_v55 = vpop.f32.mrb[37].mxu1 }
 0x49c   :  { %1313 = vst [vmem:[#allocation2 + $0x40] sm:$0xff] %v1206_v50  ;;  %v1297_v56 = vadd.f32 %v1296_v55, %v1107_v48 }
 0x49d   :  { %1315 = vst [vmem:[#allocation2 + $0x50] sm:$0xff] %v1295_v53  ;;  %1314 = vst [vmem:[#allocation2 + $0x48] sm:$0xff] %v1208_v54  ;;  %v1211_v58 = vpop.f32.mrb[38].mxu0 }
 0x49e   :  { %1316 = vst [vmem:[#allocation2 + $0x58] sm:$0xff] %v1297_v56  ;;  %v1212_v59 = vadd.f32 %v1211_v58, %v1112_v57  ;;  %v1300_v60 = vpop.f32.mrb[38].mxu1  ;;  %v1213_v61 = vpop.f32.mrb[39].mxu0 }
 0x49f   :  { %v1301_v62 = vadd.f32 %v1300_v60, %v1112_v57  ;;  %v1214_v63 = vadd.f32 %v1213_v61, %v1112_v57  ;;  %v1302_v0 = vpop.f32.mrb[39].mxu1 }
 0x4a0   :  { %1317 = vst [vmem:[#allocation2 + $0x60] sm:$0xff] %v1212_v59  ;;  %v1303_v2 = vadd.f32 %v1302_v0, %v1112_v57 }
 0x4a1   :  { %1319 = vst [vmem:[#allocation2 + $0x70] sm:$0xff] %v1301_v62  ;;  %1318 = vst [vmem:[#allocation2 + $0x68] sm:$0xff] %v1214_v63 }
 0x4a2   :  { %1320 = vst [vmem:[#allocation2 + $0x78] sm:$0xff] %v1303_v2 }
 0x4a3   :  { %1467 = shalt.err (!%p1464_p4)
}
 0x4a4   :  { %s1468_s28 = scalar_lea.hbm %s1861_s11, 2048 }
 0x4a5   :  { %p1469_p5 = scmp.ne.s32.totalorder %s1861_s11, %s1468_s28  ;;  %p1472_p6 = scmp.lt.u32.totalorder %s1468_s28, %s1861_s11 }
 0x4a7   :  { %p1474_p7 = pnand %p1472_p6, %p1469_p5 }
 0x4a9   :  { %1477 = shalt.err (!%p1474_p7)
}
 0x4aa   :  { %s1483_s12 = smov 512   ;;  %s1484_s1 = smov 32  }
 0x4ab   :  { %1332 = dma.vmem_to_hbm [thread:$0]  %s1327_s24, 2048, %s1861_s11, [#allocation3], %s1483_s12, %s1483_s12, %s1484_s1  }
 0x4ac   :  { %1478 = dma.done.wait [#allocation3], 2048  }
 0x4ad   :  { %1479 = vsyncadd [#allocation3], 4294965248 }
 0x4ae   :  { %1336 = vsyncpa [#allocation3], 1 }

</bundles_post_ra>
